<compile_context>
chip_gen: v6e
topology: v6e:2x2x1
jax: 0.10.0
libtpu: 0.0.40
codegen_flags: <defaults>
</compile_context>

<pallas_src>
import math

import jax
import jax.numpy as jnp
from jax.experimental import pallas as pl
from jax.experimental.pallas import tpu as pltpu

_LOG_SQRT_2PI = math.log(math.sqrt(2.0 * math.pi))
_LANE = 128
_SUBLANE = 8
_MAX_TILE_BYTES = 1 << 20     # 1 MiB f32 block per stream (~roofline already)
_MAX_TILE_COLS = 512          # lane-axis block (multiple of 128)


def _gauss_condition_kernel(params_ref, x_ref, y_ref, out_ref):
    # params (SMEM, f32[4]): [c1, c0, s, c2]. All scalar-only math (divides,
    # sqrt, log) is folded into the wrapper, including the -0.5 factor
    # (s = sqrt(0.5)/scale), so the body is ~5 VPU ops per element:
    #   loc = max(c1*y + c0, 0) + 0.01
    #   out = c2 - ((x - loc) * s)^2
    c1 = params_ref[0]
    c0 = params_ref[1]
    s = params_ref[2]
    c2 = params_ref[3]
    loc = jnp.maximum(c1 * y_ref[...] + c0, 0.0) + 0.01
    z = (x_ref[...] - loc) * s
    out_ref[...] = c2 - z * z


def _derived_params(k, cov, alpha, gTF_mu, gTF_sigma, gTG_mu, gTG_sigma):
    """Fold all scalar-only math into 4 constants: [c1, c0, s, c2]."""
    k = jnp.float32(k)
    cov = jnp.float32(cov)
    alpha = jnp.float32(alpha)
    gTF_mu = jnp.float32(gTF_mu)
    gTF_sigma = jnp.float32(gTF_sigma)
    gTG_mu = jnp.float32(gTG_mu)
    gTG_sigma = jnp.float32(gTG_sigma)

    inv_tf_var = 1.0 / (gTF_sigma * gTF_sigma)
    c1 = k * cov * inv_tf_var
    c0 = gTG_mu - c1 * gTF_mu
    var_term = gTG_sigma * gTG_sigma - (alpha * cov) * (alpha * cov) * inv_tf_var + 1.0
    scale = jnp.sqrt(jnp.maximum(var_term, 0.0) + 0.01)
    s = jnp.float32(math.sqrt(0.5)) / scale          # sqrt(0.5)/scale: folds the -0.5
    c2 = -(jnp.log(scale) + _LOG_SQRT_2PI)
    return jnp.stack([c1, c0, s, c2]).astype(jnp.float32)


def _round_up(v, m):
    return ((v + m - 1) // m) * m


def _pick_tiles(B, N):
    """Block policy: lane axis in 128-multiples (or full small dim), block
    footprint <= _MAX_TILE_BYTES, row tail masked via cdiv grid."""
    if N <= _MAX_TILE_COLS:
        tile_cols = N                     # full lane width: always a legal block
    else:
        tile_cols = _MAX_TILE_COLS        # multiple of 128; ragged tail masked

    rows_cap = _MAX_TILE_BYTES // (tile_cols * 4)
    rows_cap = max(_SUBLANE, (rows_cap // _SUBLANE) * _SUBLANE)
    tile_rows = B if B <= rows_cap else rows_cap   # full dim or 8-multiple
    return tile_rows, tile_cols


def _pallas_2d(x2, y2, params, *, buffer_count=2):
    B, N = x2.shape
    tile_rows, tile_cols = _pick_tiles(B, N)
    grid = (pl.cdiv(B, tile_rows), pl.cdiv(N, tile_cols))

    # VMEM budget: actual pipelined footprint + 25% headroom + 1 MiB base;
    # never below the footprint, always far below physical VMEM (and below
    # every generation's default scoped limit, so nothing is over-reserved).
    tile_bytes = tile_rows * tile_cols * 4
    footprint = 3 * max(2, buffer_count) * tile_bytes
    vmem_limit = int(max(4 << 20, footprint + footprint // 4 + (1 << 20)))

    def data_spec():
        kwargs = {}
        if buffer_count != 2:             # optional 3-deep pipeline sweep
            kwargs["pipeline_mode"] = pl.Buffered(buffer_count)
        return pl.BlockSpec((tile_rows, tile_cols), lambda i, j: (i, j), **kwargs)

    return pl.pallas_call(
        _gauss_condition_kernel,
        out_shape=jax.ShapeDtypeStruct((B, N), jnp.float32),
        grid_spec=pltpu.PrefetchScalarGridSpec(
            num_scalar_prefetch=0,
            grid=grid,
            in_specs=[
                pl.BlockSpec(memory_space=pltpu.SMEM),   # params (4 scalars)
                data_spec(),                             # x tile
                data_spec(),                             # y tile
            ],
            out_specs=pl.BlockSpec((tile_rows, tile_cols), lambda i, j: (i, j)),
        ),
        compiler_params=pltpu.CompilerParams(
            dimension_semantics=("parallel", "parallel"),
            vmem_limit_bytes=vmem_limit,
        ),
    )(params, x2, y2)


def gauss_condition_forward(
    x, y, k, cov, alpha, gTF_mu, gTF_sigma, gTG_mu, gTG_sigma,
    *, buffer_count=2,
):
    """Elementwise Normal(loc(y), scale).log_prob(x); x, y same shape."""
    x = jnp.asarray(x, jnp.float32)
    y = jnp.asarray(y, jnp.float32)
    assert x.shape == y.shape
    orig_shape = x.shape

    params = _derived_params(k, cov, alpha, gTF_mu, gTF_sigma, gTG_mu, gTG_sigma)

    # Collapse leading dims (free, row-major reshape); last dim is the lane axis.
    if x.ndim >= 2:
        N = x.shape[-1]
        x2 = x.reshape(-1, N)
        y2 = y.reshape(-1, N)
    else:
        N = int(x.size)
        x2 = x.reshape(1, -1)
        y2 = y.reshape(1, -1)
    B = x2.shape[0]

    if N >= _LANE:
        out2 = _pallas_2d(x2, y2, params, buffer_count=buffer_count)
        return out2.reshape(orig_shape)

    # Narrow last dim (< 128 lanes): lane-dense repack. The op is purely
    # elementwise, so flatten, pad to a 128-multiple column width, run the
    # same 2-D kernel (dense vst, fat DMAs), then slice the pad off.
    total = B * N
    cols = min(_MAX_TILE_COLS, _round_up(max(total, 1), _LANE))
    rows = pl.cdiv(total, cols)
    pad = rows * cols - total
    xf = x2.reshape(-1)
    yf = y2.reshape(-1)
    if pad:
        xf = jnp.pad(xf, (0, pad))
        yf = jnp.pad(yf, (0, pad))
    out2 = _pallas_2d(xf.reshape(rows, cols), yf.reshape(rows, cols), params,
                      buffer_count=buffer_count)
    return out2.reshape(-1)[:total].reshape(orig_shape)


def gauss_condition_ref(x, y, k, cov, alpha, gTF_mu, gTF_sigma, gTG_mu, gTG_sigma):
    """Pure-JAX reference matching the PyTorch forward exactly."""
    loc = jnp.maximum(gTG_mu + k * cov * (y - gTF_mu) / (gTF_sigma ** 2), 0.0) + 0.01
    scale = jnp.sqrt(
        jnp.maximum(gTG_sigma ** 2 - (alpha * cov) ** 2 / (gTF_sigma ** 2) + 1.0, 0.0) + 0.01
    )
    return -((x - loc) ** 2) / (2.0 * scale ** 2) - jnp.log(scale) - _LOG_SQRT_2PI


if __name__ == "__main__":
    key = jax.random.PRNGKey(0)

    # Deterministic "module" parameters:
    #   edge = (TF, TG, alpha, cov), k = nn.Parameter([k_init]),
    #   gaussians: gTF (mu, sigma), gTG (mu, sigma).
    # TODO(synk): the TF_high / names[...] gaussian-parameter lookup is a
    # host-side Python dict lookup in the original module; it is resolved
    # outside the kernel (both branches share identical math).
    k_init = 0.3
    alpha = 0.7
    cov = 0.5
    gTF_mu, gTF_sigma = 0.25, 1.2
    gTG_mu, gTG_sigma = -0.1, 0.9
    scalars = (k_init, cov, alpha, gTF_mu, gTF_sigma, gTG_mu, gTG_sigma)

    def check(shape, kx, ky):
        x = jax.random.normal(kx, shape, dtype=jnp.float32)
        y = jax.random.normal(ky, shape, dtype=jnp.float32)
        out = jax.block_until_ready(gauss_condition_forward(x, y, *scalars))
        ref = gauss_condition_ref(x, y, *scalars)
        return bool(out.shape == shape) and bool(
            jnp.allclose(out, ref, rtol=1e-5, atol=1e-5))

    keys = jax.random.split(key, 8)
    ok = True
    ok &= check((16, 256), keys[0], keys[1])    # lane-aligned, single block
    ok &= check((20, 200), keys[2], keys[3])    # unaligned N <= 512: full-width block
    ok &= check((8, 1536), keys[4], keys[5])    # wide N: 512-lane blocks, 2-D grid
    ok &= check((4, 40), keys[6], keys[7])      # narrow N < 128: lane-dense repack

    print("KERNEL_OK" if ok else "KERNEL_MISMATCH")
</pallas_src>

<mosaic_0001>
module attributes {stable_mosaic.version = 11 : i64} {
  func.func @_gauss_condition_kernel(%arg0: i32, %arg1: i32, %arg2: memref<4xf32, #tpu.memory_space<smem>>, %arg3: memref<16x256xf32, #tpu.memory_space<vmem>>, %arg4: memref<16x256xf32, #tpu.memory_space<vmem>>, %arg5: memref<16x256xf32, #tpu.memory_space<vmem>>) attributes {dimension_semantics = [#tpu.dimension_semantics<parallel>, #tpu.dimension_semantics<parallel>], iteration_bounds = array<i64: 1, 1>, scalar_prefetch = 0 : i64, scratch_operands = 0 : i64, tpu.core_type = #tpu.core_type<tc>, window_params = [{transform_indices = @transform_0, window_bounds = array<i64: 4>}, {transform_indices = @transform_1, window_bounds = array<i64: 16, 256>}, {transform_indices = @transform_2, window_bounds = array<i64: 16, 256>}, {transform_indices = @transform_3, window_bounds = array<i64: 16, 256>}]} {
    %c0 = arith.constant 0 : index
    %0 = memref.load %arg2[%c0] : memref<4xf32, #tpu.memory_space<smem>>
    %c1 = arith.constant 1 : index
    %1 = memref.load %arg2[%c1] : memref<4xf32, #tpu.memory_space<smem>>
    %c2 = arith.constant 2 : index
    %2 = memref.load %arg2[%c2] : memref<4xf32, #tpu.memory_space<smem>>
    %c3 = arith.constant 3 : index
    %3 = memref.load %arg2[%c3] : memref<4xf32, #tpu.memory_space<smem>>
    %c0_0 = arith.constant 0 : index
    %c0_1 = arith.constant 0 : index
    %4 = vector.load %arg4[%c0_0, %c0_1] : memref<16x256xf32, #tpu.memory_space<vmem>>, vector<16x256xf32>
    %5 = vector.broadcast %0 : f32 to vector<16x256xf32>
    %6 = arith.mulf %5, %4 : vector<16x256xf32>
    %7 = vector.broadcast %1 : f32 to vector<16x256xf32>
    %8 = arith.addf %6, %7 : vector<16x256xf32>
    %cst = arith.constant 0.000000e+00 : f32
    %9 = vector.broadcast %cst : f32 to vector<16x256xf32>
    %10 = arith.maximumf %8, %9 : vector<16x256xf32>
    %cst_2 = arith.constant 0.00999999977 : f32
    %11 = vector.broadcast %cst_2 : f32 to vector<16x256xf32>
    %12 = arith.addf %10, %11 : vector<16x256xf32>
    %c0_3 = arith.constant 0 : index
    %c0_4 = arith.constant 0 : index
    %13 = vector.load %arg3[%c0_3, %c0_4] : memref<16x256xf32, #tpu.memory_space<vmem>>, vector<16x256xf32>
    %14 = arith.subf %13, %12 : vector<16x256xf32>
    %15 = vector.broadcast %2 : f32 to vector<16x256xf32>
    %16 = arith.mulf %14, %15 : vector<16x256xf32>
    %17 = arith.mulf %16, %16 : vector<16x256xf32>
    %18 = vector.broadcast %3 : f32 to vector<16x256xf32>
    %19 = arith.subf %18, %17 : vector<16x256xf32>
    %c0_5 = arith.constant 0 : index
    %c0_6 = arith.constant 0 : index
    %20 = vector.load %arg5[%c0_5, %c0_6] : memref<16x256xf32, #tpu.memory_space<vmem>>, vector<16x256xf32>
    tpu.vector_store %arg5[%c0_5, %c0_6], %19 {strides = array<i32>} : memref<16x256xf32, #tpu.memory_space<vmem>>, vector<16x256xf32>,
    return
  }
  func.func @transform_0(%arg0: i32, %arg1: i32) -> i32 {
    %c0_i32 = arith.constant 0 : i32
    %c0_i32_0 = arith.constant 0 : i32
    return %c0_i32 : i32
  }
  func.func @transform_1(%arg0: i32, %arg1: i32) -> (i32, i32) {
    %c0_i32 = arith.constant 0 : i32
    return %arg0, %arg1 : i32, i32
  }
  func.func @transform_2(%arg0: i32, %arg1: i32) -> (i32, i32) {
    %c0_i32 = arith.constant 0 : i32
    return %arg0, %arg1 : i32, i32
  }
  func.func @transform_3(%arg0: i32, %arg1: i32) -> (i32, i32) {
    %c0_i32 = arith.constant 0 : i32
    return %arg0, %arg1 : i32, i32
  }
}

</mosaic_0001>

<bundles_post_ra>
// kernel: tpu_custom_call.1
= control target key start
LH: loop header
LB: loop body
LE: loop exit
PB: predicated region body
PF: predicated region fallthrough
CT: control target
= control target key end

     0   :  { %8 = vsyncpa [#allocation5], 0  ;;  %s257_s0 = inlined_call_operand.hbm [shape: f32[4], index: 0, kind: input, shape index: {}]   ;;  %s258_s1 = inlined_call_operand.hbm [shape: f32[16,256], index: 1, kind: input, shape index: {}]   ;;  %s259_s2 = inlined_call_operand.hbm [shape: f32[16,256], index: 2, kind: input, shape index: {}]   ;;  %s260_s3 = inlined_call_operand.hbm [shape: f32[16,256], index: 3, kind: output, shape index: {}]  }
   0x1   :  { %9 = vsyncpa [#allocation3], 0 }
   0x2   :  { %10 = vsyncpa [#allocation8], 0 }
   0x3   :  { %11 = vsyncpa [#allocation4], 0  ;;  %s210_s12 = smov [#allocation2]   ;;  %s211_s15 = smov [#allocation6]  }
   0x4   :  { %19 = dma.hbm_to_smem %s257_s0, 16, %s210_s12, [#allocation5]  }
   0x5   :  { %s25_s16 = sshll.u32 %s211_s15, 4  ;;  %s26_s16 = int_to_ptr.vmem [resolvable:$true] %s25_s16 }
   0x6   :  { %s150_s17 = scalar_lea.vmem %s26_s16, 512  ;;  %p155_p1 = scmp.lt.s32.totalorder %s26_s16, %s26_s16 }
   0x7   :  { %p151_p0 = scmp.ne.s32.totalorder %s26_s16, %s150_s17  ;;  %p156_p2 = scmp.lt.s32.totalorder %s150_s17, %s150_s17 }
   0x9   :  { %p157_p3 = por %p156_p2, %p155_p1 }
   0xb   :  { %p158_p4 = pnand %p157_p3, %p151_p0 }
   0xd   :  { %161 = shalt.err (!%p158_p4)
}
   0xe   :  { %s212_s18 = smov 256   ;;  %s213_s19 = smov 16  }
   0xf   :  { %31 = dma.hbm_to_vmem [thread:$0]  %s258_s1, 512, %s26_s16, [#allocation3], %s212_s18, %s212_s18, %s213_s19  }
  0x10   :  { %s214_s0 = smov [#allocation7]  }
  0x11   :  { %s37_s22 = sshll.u32 %s214_s0, 4  ;;  %s38_s22 = int_to_ptr.vmem [resolvable:$true] %s37_s22 }
  0x12   :  { %s170_s23 = scalar_lea.vmem %s38_s22, 512  ;;  %p175_p6 = scmp.lt.s32.totalorder %s38_s22, %s38_s22 }
  0x13   :  { %p171_p5 = scmp.ne.s32.totalorder %s38_s22, %s170_s23  ;;  %p176_p7 = scmp.lt.s32.totalorder %s170_s23, %s170_s23 }
  0x15   :  { %p177_p8 = por %p176_p7, %p175_p6 }
  0x17   :  { %p178_p9 = pnand %p177_p8, %p171_p5 }
  0x19   :  { %181 = shalt.err (!%p178_p9)
}
  0x1a   :  { %43 = dma.hbm_to_vmem [thread:$0]  %s259_s2, 512, %s38_s22, [#allocation8], %s212_s18, %s212_s18, %s213_s19  }
  0x1b   :  { %202 = dma.done.wait [#allocation5], 16  }
  0x1c   :  { %203 = vsyncadd [#allocation5], 4294967280 }
  0x1d   :  { %204 = dma.done.wait [#allocation3], 512  }
  0x1e   :  { %205 = vsyncadd [#allocation3], 4294966784 }
  0x1f   :  { %206 = dma.done.wait [#allocation8], 512  }
  0x20   :  { %207 = vsyncadd [#allocation8], 4294966784 }
  0x21   :  { %53 = sfence }
  0x22   :  { %s54_s1 = sld [smem:[#allocation2]]  ;;  %v58_v0 = vld [vmem:[#allocation7] sm:$0xff]  ;;  %v59_v1 = vld [vmem:[#allocation7 + $0x8] sm:$0xff]  ;;  %v60_v2 = vld [vmem:[#allocation7 + $0x10] sm:$0xff]  ;;  %s215_s28 = smov [#allocation9]  }
  0x23   :  { %s125_s26 = sld [smem:[#allocation2 + $0x1]]  ;;  %v61_v3 = vld [vmem:[#allocation7 + $0x18] sm:$0xff]  ;;  %v80_v15 = vld [vmem:[#allocation6] sm:$0xff]  ;;  %v81_v18 = vld [vmem:[#allocation6 + $0x8] sm:$0xff]  ;;  %s111_s29 = sshll.u32 %s215_s28, 4  ;;  %s112_s29 = int_to_ptr.vmem [resolvable:$true] %s111_s29 }
  0x24   :  { %s126_s27 = sld [smem:[#allocation2 + $0x2]]  ;;  %v82_v19 = vld [vmem:[#allocation6 + $0x10] sm:$0xff]  ;;  %v83_v21 = vld [vmem:[#allocation6 + $0x18] sm:$0xff]  ;;  %s182_s30 = scalar_lea.vmem %s112_s29, 512 }
  0x25   :  { %s127_s2 = sld [smem:[#allocation2 + $0x3]]  ;;  %p183_p10 = scmp.ne.s32.totalorder %s112_s29, %s182_s30 }
  0x26   :  { %p187_p11 = scmp.lt.s32.totalorder %s112_s29, %s112_s29  ;;  %p188_p12 = scmp.lt.s32.totalorder %s182_s30, %s182_s30 }
  0x28   :  { %v62_v4 = vstv %s54_s1  ;;  %p189_p13 = por %p188_p12, %p187_p11 }
  0x29   :  { %v63_v5 = vmul.f32 %v62_v4, %v58_v0  ;;  %v67_v6 = vstv %s125_s26  ;;  %v64_v7 = vmul.f32 %v62_v4, %v59_v1  ;;  %v65_v8 = vmul.f32 %v62_v4, %v60_v2 }
  0x2a   :  { %v66_v9 = vmul.f32 %v62_v4, %v61_v3  ;;  %v88_v25 = vstv %s126_s27  ;;  %p190_p0 = pnand %p189_p13, %p183_p10 }
  0x2b   :  { %v68_v10 = vadd.f32 %v67_v6, %v63_v5  ;;  %v69_v11 = vadd.f32 %v67_v6, %v64_v7  ;;  %v70_v12 = vadd.f32 %v67_v6, %v65_v8  ;;  %v97_v34 = vstv %s127_s2 }
  0x2c   :  { %v71_v13 = vadd.f32 %v67_v6, %v66_v9 }
  0x2d   :  { %v72_v14 = vmax.f32 %v68_v10, 0.0  ;;  %v73_v16 = vmax.f32 %v69_v11, 0.0  ;;  %v74_v17 = vmax.f32 %v70_v12, 0.0 }
  0x2e   :  { %v75_v20 = vmax.f32 %v71_v13, 0.0 }
  0x2f   :  { %v76_v22 = vadd.f32 0.01, %v72_v14  ;;  %v77_v23 = vadd.f32 0.01, %v73_v16  ;;  %v78_v24 = vadd.f32 0.01, %v74_v17 }
  0x30   :  { %v79_v26 = vadd.f32 0.01, %v75_v20 }
  0x31   :  { %v84_v27 = vsub.f32 %v80_v15, %v76_v22  ;;  %v85_v28 = vsub.f32 %v81_v18, %v77_v23  ;;  %v86_v29 = vsub.f32 %v82_v19, %v78_v24 }
  0x32   :  { %v87_v30 = vsub.f32 %v83_v21, %v79_v26 }
  0x33   :  { %v89_v31 = vmul.f32 %v88_v25, %v84_v27  ;;  %v90_v32 = vmul.f32 %v88_v25, %v85_v28  ;;  %v91_v33 = vmul.f32 %v88_v25, %v86_v29 }
  0x34   :  { %v92_v35 = vmul.f32 %v88_v25, %v87_v30 }
  0x35   :  { %v93_v36 = vmul.f32 %v89_v31, %v89_v31  ;;  %v94_v37 = vmul.f32 %v90_v32, %v90_v32  ;;  %v95_v38 = vmul.f32 %v91_v33, %v91_v33 }
  0x36   :  { %v96_v39 = vmul.f32 %v92_v35, %v92_v35 }
  0x37   :  { %v98_v40 = vsub.f32 %v97_v34, %v93_v36  ;;  %v99_v41 = vsub.f32 %v97_v34, %v94_v37  ;;  %v100_v42 = vsub.f32 %v97_v34, %v95_v38 }
  0x38   :  { %v101_v43 = vsub.f32 %v97_v34, %v96_v39 }
  0x39   :  { %102 = vst [vmem:[#allocation9] sm:$0xff] %v98_v40  ;;  %103 = vst [vmem:[#allocation9 + $0x8] sm:$0xff] %v99_v41 }
  0x3a   :  { %104 = vst [vmem:[#allocation9 + $0x10] sm:$0xff] %v100_v42  ;;  %105 = vst [vmem:[#allocation9 + $0x18] sm:$0xff] %v101_v43 }
  0x3b   :  { %193 = shalt.err (!%p190_p0)
}
  0x3c   :  { %117 = dma.vmem_to_hbm [thread:$0]  %s112_s29, 512, %s260_s3, [#allocation4], %s212_s18, %s212_s18, %s213_s19  }
  0x3d   :  { %208 = dma.done.wait [#allocation4], 512  }
  0x3e   :  { %209 = vsyncadd [#allocation4], 4294966784 }
  0x3f   :  { %121 = vsyncpa [#allocation3], 1 }
  0x40   :  { %122 = vsyncpa [#allocation8], 1 }
  0x41   :  { %123 = vsyncpa [#allocation4], 1 }
  0x42   :  { %124 = vsyncpa [#allocation5], 1 }

</bundles_post_ra>
